<compile_context>
chip_gen: v5e
topology: v5e:2x2
jax: 0.10.0
libtpu: 0.0.40
codegen_flags: <defaults>
</compile_context>

<pallas_src>
import functools

import jax
import jax.numpy as jnp
from jax import lax
from jax.experimental import pallas as pl
from jax.experimental.pallas import tpu as pltpu

_NEG = -1e30  # "-inf" stand-in that stays NaN-free under exp()


def _round_up(v, m):
    return ((v + m - 1) // m) * m


def _cdiv(a, b):
    return -(-a // b)


def _physical_vmem_bytes():
    """Best-effort physical VMEM query (falls back to the v7x 64 MiB floor)."""
    try:
        info = pltpu.get_tpu_info()
        for attr in ("vmem_capacity_bytes", "vmem_size_bytes", "vmem_bytes"):
            v = getattr(info, attr, None)
            if v:
                return int(v)
    except Exception:
        pass
    return 64 * 1024 * 1024


def _contrastive_kernel(xr_ref, xc_ref, labr_ref, labc_ref, out_ref,
                        m_ref, l_ref, num_ref, pos_ref,
                        *, inv_tau, num_views, tr, tc, l_actual):
    i = pl.program_id(0)          # row tile      ("parallel")
    k = pl.program_id(1)          # column / reduction tile ("arbitrary", last)

    @pl.when(k == 0)
    def _init():
        m_ref[...] = jnp.full(m_ref.shape, _NEG, jnp.float32)
        l_ref[...] = jnp.zeros(l_ref.shape, jnp.float32)
        num_ref[...] = jnp.zeros(num_ref.shape, jnp.float32)
        pos_ref[...] = jnp.zeros(pos_ref.shape, jnp.float32)

    # (tr, tc) similarity tile on the MXU: contract the feature dim of BOTH
    # operands (NT layout, no pre-transposed input).  Operands stay in their
    # storage dtype (bf16 feeds the MXU natively); accumulation is f32; the
    # 1/tau divide is folded into a constant multiply.
    m_tile = lax.dot_general(
        xr_ref[...], xc_ref[...],
        dimension_numbers=(((1,), (1,)), ((), ())),
        preferred_element_type=jnp.float32) * inv_tau

    # Thin index vectors; full-tile VALU work is limited to the unavoidable
    # broadcast compares/selects.
    cloc = lax.broadcasted_iota(jnp.int32, (1, tc), 1)
    col_ok = (k * tc + cloc) < l_actual                    # (1, tc)

    labc = labc_ref[pl.ds(k, 1), :]                        # (1, tc) resident labels
    if num_views > 1:
        rloc = lax.broadcasted_iota(jnp.int32, (tr, 1), 0)
        # Global diagonal hits tile element (r, c) iff i*tr + r == k*tc + c.
        # Folding the scalar tile offset keeps this a single broadcast compare
        # and it is all-false for every off-diagonal tile.
        off = k * tc - i * tr
        keep = col_ok & (rloc != cloc + off)               # mask_i tile
    else:
        keep = col_ok                                      # mask_i == all ones
    pos_m = keep & (labr_ref[...] == labc)                 # mask_j tile

    # Online rowmax / rescaled softmax denominator.  The rowmax runs over ALL
    # valid columns (diagonal included), exactly like torch.max(M, dim=1).
    m_valid = jnp.where(col_ok, m_tile, _NEG)
    m_keep = m_valid if num_views == 1 else jnp.where(keep, m_tile, _NEG)
    m_old = m_ref[...]
    m_new = jnp.maximum(m_old, jnp.max(m_valid, axis=1, keepdims=True))
    alpha = jnp.exp(m_old - m_new)
    p = jnp.exp(m_keep - m_new)                            # == s * mask_i
    l_ref[...] = alpha * l_ref[...] + jnp.sum(p, axis=1, keepdims=True)
    num_ref[...] += jnp.sum(jnp.where(pos_m, m_tile, 0.0), axis=1, keepdims=True)
    pos_ref[...] += jnp.sum(pos_m.astype(jnp.float32), axis=1, keepdims=True)
    m_ref[...] = m_new

    @pl.when(k == pl.num_programs(1) - 1)
    def _finalize():
        s_i = jnp.maximum(l_ref[...], 1e-10)               # torch clamp on s_i
        # LSE rewrite: log_p_i = log(s_i) + rowmax_i - (sum_j mask_j*M_ij)/pos_i
        log_p = jnp.log(s_i) + m_ref[...] - num_ref[...] / pos_ref[...]
        row_ok = (i * tr + lax.broadcasted_iota(jnp.int32, (tr, 1), 0)) < l_actual
        tile_sum = jnp.sum(jnp.where(row_ok, log_p, 0.0))
        # Lane-dense (1, 8, 128) partial-sum block; wrapper finishes the mean.
        out_ref[...] = jnp.full(out_ref.shape, tile_sum, jnp.float32)


def contrastive_loss_base(batch_label, *x, tau=5.0, matmul_dtype=jnp.bfloat16):
    """JAX/Pallas equivalent of Contrastive_Loss_base.forward(batch_label, *x).

    Notes:
      * Labels are compared exactly as int32 class ids.
      * `matmul_dtype=jnp.bfloat16` (default) feeds the MXU bf16 operands with
        f32 accumulation; pass `matmul_dtype=None` to keep the input dtype.
      * The LSE rewrite drops PyTorch's clamp of s_j=exp(M_ij-rowmax) at 1e-10;
        results only diverge if a positive pair sits > ~23 logits below the
        row max (deep underflow region).
      * A row with no positive pair (label unique across all views) produces
        0/0 = NaN, exactly like the PyTorch reference's divide-by-zero.
    """
    num_views = len(x)
    X = x[0] if num_views == 1 else jnp.concatenate(x, axis=0)   # (L, D)
    if matmul_dtype is not None and X.dtype != matmul_dtype:
        X = X.astype(matmul_dtype)
    labels = jnp.asarray(batch_label).astype(jnp.int32)
    if num_views > 1:
        labels = jnp.concatenate([labels] * num_views, axis=0)
    L, D = X.shape
    d_pad = _round_up(D, 128)              # zero-padding D does not change X @ X.T
    elem_bytes = X.dtype.itemsize

    # Generation-aware VMEM budget: ~3/4 of physical, capped at 96 MiB
    # (=> 96 MiB on 128-MiB v5e/v6e, 48 MiB on 64-MiB v7x).
    vmem_limit = min(96 * 1024 * 1024, _physical_vmem_bytes() * 3 // 4)

    # ---- tile selection ----
    if L <= 256:
        tr = _round_up(L, 8)
        tc = _round_up(L, 128)             # lane-dense epilogue even for tiny L
    else:
        tc = 256
        # 512-row resident tile halves HBM re-streaming of the column operand;
        # keep >= 2 row tiles for 256 < L <= 512 so both v7x TCs get work.
        tr = 512 if L > 512 else 256
        while tr > 256 and 2 * (tr + tc) * d_pad * elem_bytes > (3 * vmem_limit) // 4:
            tr //= 2
        # TODO(synk): add a K-tiled contraction axis (third, innermost grid dim
        # over d_pad chunks) for feature dims too wide to keep a full
        # (tile, d_pad) block double-buffered in VMEM.

    n_i = _cdiv(L, tr)                     # only tiles containing real rows/cols
    n_k = _cdiv(L, tc)
    l_pad = max(n_i * tr, n_k * tc)        # always a multiple of tc

    # Conditional padding (skip the HBM round-trip when already aligned).
    if l_pad != L or d_pad != D:
        xp = jnp.pad(X, ((0, l_pad - L), (0, d_pad - D)))
    else:
        xp = X
    lab = labels if l_pad == L else jnp.pad(labels, (0, l_pad - L),
                                            constant_values=-1)
    lab_row = lab.reshape(l_pad, 1)
    lab_col = lab.reshape(l_pad // tc, tc)   # row k == labels of column tile k

    kernel = functools.partial(
        _contrastive_kernel, inv_tau=1.0 / float(tau), num_views=num_views,
        tr=tr, tc=tc, l_actual=L)

    partials = pl.pallas_call(
        kernel,
        out_shape=jax.ShapeDtypeStruct((n_i, 8, 128), jnp.float32),
        grid_spec=pltpu.PrefetchScalarGridSpec(
            num_scalar_prefetch=0,
            grid=(n_i, n_k),
            in_specs=[
                pl.BlockSpec((tr, d_pad), lambda i, k: (i, 0)),        # X rows (resident over k)
                pl.BlockSpec((tc, d_pad), lambda i, k: (k, 0)),        # X cols (streamed)
                pl.BlockSpec((tr, 1), lambda i, k: (i, 0)),            # row labels (per row tile)
                pl.BlockSpec((l_pad // tc, tc), lambda i, k: (0, 0)),  # all col labels, resident
            ],
            out_specs=pl.BlockSpec((1, 8, 128), lambda i, k: (i, 0, 0)),
            scratch_shapes=[pltpu.VMEM((tr, 1), jnp.float32)] * 4,     # m, l, num, pos
        ),
        compiler_params=pltpu.CompilerParams(
            dimension_semantics=("parallel", "arbitrary"),
            vmem_limit_bytes=int(vmem_limit)),
    )(xp, xp, lab_row, lab_col)

    # Tiny finalization in XLA: sum of per-row-tile partials -> mean over L rows.
    return jnp.sum(partials[:, 0, 0]) / jnp.float32(L)


def _reference_loss(batch_label, *x, tau=5.0):
    """Pure-JAX reference replicating the PyTorch forward exactly (f32)."""
    num_views = len(x)
    X = jnp.concatenate([xi.astype(jnp.float32) for xi in x], axis=0)
    labels = jnp.concatenate([jnp.asarray(batch_label)] * num_views, axis=0)
    L = labels.shape[0]
    M = (X @ X.T) / tau
    s = jnp.exp(M - jnp.max(M, axis=1, keepdims=True))
    if num_views == 1:
        mask_i = jnp.ones((L, L), jnp.float32)
    else:
        mask_i = 1.0 - jnp.eye(L, dtype=jnp.float32)
    mask_j = (labels[:, None] == labels[None, :]).astype(jnp.float32) * mask_i
    pos_num = jnp.sum(mask_j, axis=1)
    s_i = jnp.maximum(jnp.sum(s * mask_i, axis=1), 1e-10)
    s_j = jnp.maximum(s * mask_j, 1e-10)
    log_p = jnp.sum(-jnp.log(s_j / s_i[:, None]) * mask_j, axis=1) / pos_num
    return jnp.mean(log_p)


if __name__ == "__main__":
    key = jax.random.PRNGKey(0)
    k_lab, k_x1, k_x2, k_lab2, k_x3, k_x4 = jax.random.split(key, 6)

    # Small two-view case (L = 16, D = 32), exact f32 path -> single-tile grid.
    N, D = 8, 32
    batch_label = jax.random.randint(k_lab, (N,), 0, 3, dtype=jnp.int32)
    x1 = jax.random.normal(k_x1, (N, D), dtype=jnp.float32)
    x2 = jax.random.normal(k_x2, (N, D), dtype=jnp.float32)
    loss = jax.block_until_ready(
        contrastive_loss_base(batch_label, x1, x2, tau=5.0, matmul_dtype=None))
    ref = _reference_loss(batch_label, x1, x2, tau=5.0)
    assert jnp.allclose(loss, ref, rtol=1e-4, atol=1e-4), (loss, ref)

    # Single-view case (mask_i == all ones), L = 8, exact f32 path.
    loss1 = jax.block_until_ready(
        contrastive_loss_base(batch_label, x1, tau=5.0, matmul_dtype=None))
    ref1 = _reference_loss(batch_label, x1, tau=5.0)
    assert jnp.allclose(loss1, ref1, rtol=1e-4, atol=1e-4), (loss1, ref1)

    # Default bf16-MXU path: compare against the reference on the SAME
    # bf16-rounded inputs (MXU bf16 x bf16 products are exact in f32).
    x1b, x2b = x1.astype(jnp.bfloat16), x2.astype(jnp.bfloat16)
    loss_b = jax.block_until_ready(
        contrastive_loss_base(batch_label, x1b, x2b, tau=5.0))
    ref_b = _reference_loss(batch_label, x1b, x2b, tau=5.0)
    assert jnp.allclose(loss_b, ref_b, rtol=2e-3, atol=2e-3), (loss_b, ref_b)

    # Larger two-view case (L = 320 > 256) exercising the multi-tile / padded
    # path with the default bf16 MXU operands.
    N2, D2 = 160, 64
    batch_label2 = jax.random.randint(k_lab2, (N2,), 0, 5, dtype=jnp.int32)
    x3 = jax.random.normal(k_x3, (N2, D2), dtype=jnp.bfloat16)
    x4 = jax.random.normal(k_x4, (N2, D2), dtype=jnp.bfloat16)
    loss2 = jax.block_until_ready(
        contrastive_loss_base(batch_label2, x3, x4, tau=5.0))
    ref2 = _reference_loss(batch_label2, x3, x4, tau=5.0)
    assert jnp.allclose(loss2, ref2, rtol=2e-3, atol=2e-3), (loss2, ref2)

    print("KERNEL_OK")
</pallas_src>

<mosaic_0001>
module attributes {stable_mosaic.version = 11 : i64} {
  func.func @_contrastive_kernel(%arg0: i32, %arg1: i32, %arg2: memref<16x128xf32, #tpu.memory_space<vmem>>, %arg3: memref<128x128xf32, #tpu.memory_space<vmem>>, %arg4: memref<16x1xi32, #tpu.memory_space<vmem>>, %arg5: memref<1x128xi32, #tpu.memory_space<vmem>>, %arg6: memref<1x8x128xf32, #tpu.memory_space<vmem>>, %arg7: memref<16x1xf32, #tpu.memory_space<vmem>>, %arg8: memref<16x1xf32, #tpu.memory_space<vmem>>, %arg9: memref<16x1xf32, #tpu.memory_space<vmem>>, %arg10: memref<16x1xf32, #tpu.memory_space<vmem>>) attributes {dimension_semantics = [#tpu.dimension_semantics<parallel>, #tpu.dimension_semantics<arbitrary>], iteration_bounds = array<i64: 1, 1>, scalar_prefetch = 0 : i64, scratch_operands = 4 : i64, tpu.core_type = #tpu.core_type<tc>, window_params = [{transform_indices = @transform_0, window_bounds = array<i64: 16, 128>}, {transform_indices = @transform_1, window_bounds = array<i64: 128, 128>}, {transform_indices = @transform_2, window_bounds = array<i64: 16, 1>}, {pipeline_mode = #tpu.pipeline_mode<synchronous>, transform_indices = @transform_3, window_bounds = array<i64: 1, 128>}, {transform_indices = @transform_4, window_bounds = array<i64: 1, 8, 128>}]} {
    %c0_i32 = arith.constant 0 : i32
    %0 = arith.cmpi eq, %arg1, %c0_i32 : i32
    %1 = arith.extui %0 : i1 to i32
    %c0_i32_0 = arith.constant 0 : i32
    %2 = arith.cmpi ne, %1, %c0_i32_0 : i32
    scf.if %2 {
      %cst_35 = arith.constant -1.000000e+30 : f32
      %71 = vector.broadcast %cst_35 : f32 to vector<16x1xf32>
      %c0_36 = arith.constant 0 : index
      %c0_37 = arith.constant 0 : index
      %72 = vector.load %arg7[%c0_36, %c0_37] : memref<16x1xf32, #tpu.memory_space<vmem>>, vector<16x1xf32>
      tpu.vector_store %arg7[%c0_36, %c0_37], %71 {strides = array<i32>} : memref<16x1xf32, #tpu.memory_space<vmem>>, vector<16x1xf32>,
      %cst_38 = arith.constant 0.000000e+00 : f32
      %73 = vector.broadcast %cst_38 : f32 to vector<16x1xf32>
      %c0_39 = arith.constant 0 : index
      %c0_40 = arith.constant 0 : index
      %74 = vector.load %arg8[%c0_39, %c0_40] : memref<16x1xf32, #tpu.memory_space<vmem>>, vector<16x1xf32>
      tpu.vector_store %arg8[%c0_39, %c0_40], %73 {strides = array<i32>} : memref<16x1xf32, #tpu.memory_space<vmem>>, vector<16x1xf32>,
      %cst_41 = arith.constant 0.000000e+00 : f32
      %75 = vector.broadcast %cst_41 : f32 to vector<16x1xf32>
      %c0_42 = arith.constant 0 : index
      %c0_43 = arith.constant 0 : index
      %76 = vector.load %arg9[%c0_42, %c0_43] : memref<16x1xf32, #tpu.memory_space<vmem>>, vector<16x1xf32>
      tpu.vector_store %arg9[%c0_42, %c0_43], %75 {strides = array<i32>} : memref<16x1xf32, #tpu.memory_space<vmem>>, vector<16x1xf32>,
      %cst_44 = arith.constant 0.000000e+00 : f32
      %77 = vector.broadcast %cst_44 : f32 to vector<16x1xf32>
      %c0_45 = arith.constant 0 : index
      %c0_46 = arith.constant 0 : index
      %78 = vector.load %arg10[%c0_45, %c0_46] : memref<16x1xf32, #tpu.memory_space<vmem>>, vector<16x1xf32>
      tpu.vector_store %arg10[%c0_45, %c0_46], %77 {strides = array<i32>} : memref<16x1xf32, #tpu.memory_space<vmem>>, vector<16x1xf32>,
    } else {
    }
    %c0 = arith.constant 0 : index
    %c0_1 = arith.constant 0 : index
    %3 = vector.load %arg2[%c0, %c0_1] : memref<16x128xf32, #tpu.memory_space<vmem>>, vector<16x128xf32>
    %c0_2 = arith.constant 0 : index
    %c0_3 = arith.constant 0 : index
    %4 = vector.load %arg3[%c0_2, %c0_3] : memref<128x128xf32, #tpu.memory_space<vmem>>, vector<128x128xf32>
    %cst = arith.constant dense<0.000000e+00> : vector<16x128xf32>
    %5 = tpu.matmul %3, %4, %cst {dimension_numbers = #tpu.dot_dimension_numbers<[1], [1], [0], [0], [0, 0, 1, 0], [], []>} : vector<16x128xf32>, vector<128x128xf32>, vector<16x128xf32> -> vector<16x128xf32>
    %cst_4 = arith.constant 2.000000e-01 : f32
    %6 = vector.broadcast %cst_4 : f32 to vector<16x128xf32>
    %7 = arith.mulf %5, %6 : vector<16x128xf32>
    %8 = tpu.iota {dimensions = array<i32: 1>} : vector<1x128xi32>
    %c128_i32 = arith.constant 128 : i32
    %9 = arith.muli %arg1, %c128_i32 : i32
    %10 = vector.broadcast %9 : i32 to vector<1x128xi32>
    %11 = arith.addi %10, %8 : vector<1x128xi32>
    %c16_i32 = arith.constant 16 : i32
    %12 = vector.broadcast %c16_i32 : i32 to vector<1x128xi32>
    %13 = arith.cmpi slt, %11, %12 : vector<1x128xi32>
    %14 = arith.index_cast %arg1 : i32 to index
    %c0_5 = arith.constant 0 : index
    %15 = vector.load %arg5[%14, %c0_5] : memref<1x128xi32, #tpu.memory_space<vmem>>, vector<1x128xi32>
    %16 = tpu.iota {dimensions = array<i32: 0>} : vector<16x1xi32>
    %c128_i32_6 = arith.constant 128 : i32
    %17 = arith.muli %arg1, %c128_i32_6 : i32
    %c16_i32_7 = arith.constant 16 : i32
    %18 = arith.muli %arg0, %c16_i32_7 : i32
    %19 = arith.subi %17, %18 : i32
    %20 = vector.broadcast %19 : i32 to vector<1x128xi32>
    %21 = arith.addi %8, %20 : vector<1x128xi32>
    %22 = vector.broadcast %16 : vector<16x1xi32> to vector<16x128xi32>
    %23 = vector.broadcast %21 : vector<1x128xi32> to vector<16x128xi32>
    %24 = arith.cmpi ne, %22, %23 : vector<16x128xi32>
    %25 = vector.broadcast %13 : vector<1x128xi1> to vector<16x128xi1>
    %26 = arith.andi %25, %24 : vector<16x128xi1>
    %c0_8 = arith.constant 0 : index
    %c0_9 = arith.constant 0 : index
    %27 = vector.load %arg4[%c0_8, %c0_9] : memref<16x1xi32, #tpu.memory_space<vmem>>, vector<16x1xi32>
    %28 = vector.broadcast %27 : vector<16x1xi32> to vector<16x128xi32>
    %29 = vector.broadcast %15 : vector<1x128xi32> to vector<16x128xi32>
    %30 = arith.cmpi eq, %28, %29 : vector<16x128xi32>
    %31 = arith.andi %26, %30 : vector<16x128xi1>
    %cst_10 = arith.constant -1.000000e+30 : f32
    %32 = vector.shape_cast %13 : vector<1x128xi1> to vector<1x128xi1>
    %33 = vector.broadcast %32 : vector<1x128xi1> to vector<16x128xi1>
    %34 = vector.broadcast %cst_10 : f32 to vector<16x128xf32>
    %35 = arith.select %33, %7, %34 : vector<16x128xi1>, vector<16x128xf32>
    %cst_11 = arith.constant -1.000000e+30 : f32
    %36 = vector.broadcast %cst_11 : f32 to vector<16x128xf32>
    %37 = arith.select %26, %7, %36 : vector<16x128xi1>, vector<16x128xf32>
    %c0_12 = arith.constant 0 : index
    %c0_13 = arith.constant 0 : index
    %38 = vector.load %arg7[%c0_12, %c0_13] : memref<16x1xf32, #tpu.memory_space<vmem>>, vector<16x1xf32>
    %cst_14 = arith.constant dense<0xFF800000> : vector<16xf32>
    %39 = vector.multi_reduction <maximumf>, %35, %cst_14 [1] : vector<16x128xf32> to vector<16xf32>
    %40 = vector.shape_cast %39 : vector<16xf32> to vector<16x1xf32>
    %41 = arith.maximumf %38, %40 : vector<16x1xf32>
    %42 = arith.subf %38, %41 : vector<16x1xf32>
    %43 = math.exp %42 : vector<16x1xf32>
    %44 = vector.broadcast %41 : vector<16x1xf32> to vector<16x128xf32>
    %45 = arith.subf %37, %44 : vector<16x128xf32>
    %46 = math.exp %45 : vector<16x128xf32>
    %c0_15 = arith.constant 0 : index
    %c0_16 = arith.constant 0 : index
    %47 = vector.load %arg8[%c0_15, %c0_16] : memref<16x1xf32, #tpu.memory_space<vmem>>, vector<16x1xf32>
    %48 = arith.mulf %43, %47 : vector<16x1xf32>
    %cst_17 = arith.constant dense<0.000000e+00> : vector<16xf32>
    %49 = vector.multi_reduction <add>, %46, %cst_17 [1] : vector<16x128xf32> to vector<16xf32>
    %50 = vector.shape_cast %49 : vector<16xf32> to vector<16x1xf32>
    %51 = arith.addf %48, %50 : vector<16x1xf32>
    %c0_18 = arith.constant 0 : index
    %c0_19 = arith.constant 0 : index
    %52 = vector.load %arg8[%c0_18, %c0_19] : memref<16x1xf32, #tpu.memory_space<vmem>>, vector<16x1xf32>
    tpu.vector_store %arg8[%c0_18, %c0_19], %51 {strides = array<i32>} : memref<16x1xf32, #tpu.memory_space<vmem>>, vector<16x1xf32>,
    %c0_20 = arith.constant 0 : index
    %c0_21 = arith.constant 0 : index
    %53 = vector.load %arg9[%c0_20, %c0_21] : memref<16x1xf32, #tpu.memory_space<vmem>>, vector<16x1xf32>
    %cst_22 = arith.constant 0.000000e+00 : f32
    %54 = vector.broadcast %cst_22 : f32 to vector<16x128xf32>
    %55 = arith.select %31, %7, %54 : vector<16x128xi1>, vector<16x128xf32>
    %cst_23 = arith.constant dense<0.000000e+00> : vector<16xf32>
    %56 = vector.multi_reduction <add>, %55, %cst_23 [1] : vector<16x128xf32> to vector<16xf32>
    %57 = vector.shape_cast %56 : vector<16xf32> to vector<16x1xf32>
    %58 = arith.addf %53, %57 : vector<16x1xf32>
    %c0_24 = arith.constant 0 : index
    %c0_25 = arith.constant 0 : index
    %59 = vector.load %arg9[%c0_24, %c0_25] : memref<16x1xf32, #tpu.memory_space<vmem>>, vector<16x1xf32>
    tpu.vector_store %arg9[%c0_24, %c0_25], %58 {strides = array<i32>} : memref<16x1xf32, #tpu.memory_space<vmem>>, vector<16x1xf32>,
    %c0_26 = arith.constant 0 : index
    %c0_27 = arith.constant 0 : index
    %60 = vector.load %arg10[%c0_26, %c0_27] : memref<16x1xf32, #tpu.memory_space<vmem>>, vector<16x1xf32>
    %61 = arith.extui %31 : vector<16x128xi1> to vector<16x128xi32>
    %62 = arith.sitofp %61 : vector<16x128xi32> to vector<16x128xf32>
    %cst_28 = arith.constant dense<0.000000e+00> : vector<16xf32>
    %63 = vector.multi_reduction <add>, %62, %cst_28 [1] : vector<16x128xf32> to vector<16xf32>
    %64 = vector.shape_cast %63 : vector<16xf32> to vector<16x1xf32>
    %65 = arith.addf %60, %64 : vector<16x1xf32>
    %c0_29 = arith.constant 0 : index
    %c0_30 = arith.constant 0 : index
    %66 = vector.load %arg10[%c0_29, %c0_30] : memref<16x1xf32, #tpu.memory_space<vmem>>, vector<16x1xf32>
    tpu.vector_store %arg10[%c0_29, %c0_30], %65 {strides = array<i32>} : memref<16x1xf32, #tpu.memory_space<vmem>>, vector<16x1xf32>,
    %c0_31 = arith.constant 0 : index
    %c0_32 = arith.constant 0 : index
    %67 = vector.load %arg7[%c0_31, %c0_32] : memref<16x1xf32, #tpu.memory_space<vmem>>, vector<16x1xf32>
    tpu.vector_store %arg7[%c0_31, %c0_32], %41 {strides = array<i32>} : memref<16x1xf32, #tpu.memory_space<vmem>>, vector<16x1xf32>,
    %c0_i32_33 = arith.constant 0 : i32
    %68 = arith.cmpi eq, %arg1, %c0_i32_33 : i32
    %69 = arith.extui %68 : i1 to i32
    %c0_i32_34 = arith.constant 0 : i32
    %70 = arith.cmpi ne, %69, %c0_i32_34 : i32
    scf.if %70 {
      %c0_35 = arith.constant 0 : index
      %c0_36 = arith.constant 0 : index
      %71 = vector.load %arg8[%c0_35, %c0_36] : memref<16x1xf32, #tpu.memory_space<vmem>>, vector<16x1xf32>
      %cst_37 = arith.constant 1.000000e-10 : f32
      %72 = vector.broadcast %cst_37 : f32 to vector<16x1xf32>
      %73 = arith.maximumf %71, %72 : vector<16x1xf32>
      %74 = math.log %73 : vector<16x1xf32>
      %c0_38 = arith.constant 0 : index
      %c0_39 = arith.constant 0 : index
      %75 = vector.load %arg7[%c0_38, %c0_39] : memref<16x1xf32, #tpu.memory_space<vmem>>, vector<16x1xf32>
      %76 = arith.addf %74, %75 : vector<16x1xf32>
      %c0_40 = arith.constant 0 : index
      %c0_41 = arith.constant 0 : index
      %77 = vector.load %arg9[%c0_40, %c0_41] : memref<16x1xf32, #tpu.memory_space<vmem>>, vector<16x1xf32>
      %c0_42 = arith.constant 0 : index
      %c0_43 = arith.constant 0 : index
      %78 = vector.load %arg10[%c0_42, %c0_43] : memref<16x1xf32, #tpu.memory_space<vmem>>, vector<16x1xf32>
      %79 = arith.divf %77, %78 : vector<16x1xf32>
      %80 = arith.subf %76, %79 : vector<16x1xf32>
      %c16_i32_44 = arith.constant 16 : i32
      %81 = arith.muli %arg0, %c16_i32_44 : i32
      %82 = tpu.iota {dimensions = array<i32: 0>} : vector<16x1xi32>
      %83 = vector.broadcast %81 : i32 to vector<16x1xi32>
      %84 = arith.addi %83, %82 : vector<16x1xi32>
      %c16_i32_45 = arith.constant 16 : i32
      %85 = vector.broadcast %c16_i32_45 : i32 to vector<16x1xi32>
      %86 = arith.cmpi slt, %84, %85 : vector<16x1xi32>
      %cst_46 = arith.constant 0.000000e+00 : f32
      %87 = vector.broadcast %cst_46 : f32 to vector<16x1xf32>
      %88 = arith.select %86, %80, %87 : vector<16x1xi1>, vector<16x1xf32>
      %89 = vector.shape_cast %88 : vector<16x1xf32> to vector<1x16x1xf32>
      %cst_47 = arith.constant dense<0.000000e+00> : vector<1xf32>
      %90 = vector.multi_reduction <add>, %89, %cst_47 [1, 2] : vector<1x16x1xf32> to vector<1xf32>
      %91 = vector.shape_cast %90 : vector<1xf32> to vector<1x1x1xf32>
      %92 = vector.extract %91[0, 0, 0] : f32 from vector<1x1x1xf32>
      %93 = vector.broadcast %92 : f32 to vector<1x8x128xf32>
      %c0_48 = arith.constant 0 : index
      %c0_49 = arith.constant 0 : index
      %c0_50 = arith.constant 0 : index
      %94 = vector.load %arg6[%c0_48, %c0_49, %c0_50] : memref<1x8x128xf32, #tpu.memory_space<vmem>>, vector<1x8x128xf32>
      tpu.vector_store %arg6[%c0_48, %c0_49, %c0_50], %93 {strides = array<i32>} : memref<1x8x128xf32, #tpu.memory_space<vmem>>, vector<1x8x128xf32>,
    } else {
    }
    return
  }
  func.func @transform_0(%arg0: i32, %arg1: i32) -> (i32, i32) {
    %c0_i32 = arith.constant 0 : i32
    %c0_i32_0 = arith.constant 0 : i32
    return %arg0, %c0_i32 : i32, i32
  }
  func.func @transform_1(%arg0: i32, %arg1: i32) -> (i32, i32) {
    %c0_i32 = arith.constant 0 : i32
    %c0_i32_0 = arith.constant 0 : i32
    return %arg1, %c0_i32 : i32, i32
  }
  func.func @transform_2(%arg0: i32, %arg1: i32) -> (i32, i32) {
    %c0_i32 = arith.constant 0 : i32
    %c0_i32_0 = arith.constant 0 : i32
    return %arg0, %c0_i32 : i32, i32
  }
  func.func @transform_3(%arg0: i32, %arg1: i32) -> (i32, i32) {
    %c0_i32 = arith.constant 0 : i32
    %c0_i32_0 = arith.constant 0 : i32
    %c0_i32_1 = arith.constant 0 : i32
    return %c0_i32, %c0_i32_0 : i32, i32
  }
  func.func @transform_4(%arg0: i32, %arg1: i32) -> (i32, i32, i32) {
    %c0_i32 = arith.constant 0 : i32
    %c0_i32_0 = arith.constant 0 : i32
    %c0_i32_1 = arith.constant 0 : i32
    return %arg0, %c0_i32, %c0_i32_0 : i32, i32, i32
  }
}

</mosaic_0001>

<bundles_post_ra>
// kernel: tpu_custom_call.1
= control target key start
LH: loop header
LB: loop body
LE: loop exit
PB: predicated region body
PF: predicated region fallthrough
CT: control target
= control target key end

     0   :  { %9 = vsyncpa [#allocation7], 0  ;;  %s499_s0 = inlined_call_operand.vmem [shape: f32[128,128], index: 0, kind: input, shape index: {}]   ;;  %s500_s1 = inlined_call_operand.hbm [shape: f32[128,128], index: 1, kind: input, shape index: {}]   ;;  %s501_s2 = inlined_call_operand.vmem [shape: s32[128,1], index: 2, kind: input, shape index: {}]   ;;  %s502_s3 = inlined_call_operand.vmem [shape: s32[1,128], index: 3, kind: input, shape index: {}]   ;;  %s503_s4 = inlined_call_operand.hbm [shape: f32[1,8,128], index: 4, kind: output, shape index: {}]  }
   0x1   :  { %10 = vsyncpa [#allocation8], 0  ;;  %s17_s17 = sshll.u32 %s500_s1, 4  ;;  %s386_s18 = smov [#allocation6]   ;;  %s18_s17 = int_to_ptr.hbm [resolvable:$true] %s17_s17 }
   0x2   :  { %s19_s19 = sshll.u32 %s386_s18, 4  ;;  %s387_s20 = smov 128   ;;  %s20_s19 = int_to_ptr.vmem [resolvable:$true] %s19_s19 }
   0x3   :  { %s388_s21 = smov 8  }
   0x4   :  { %25 = dma.hbm_to_vmem [thread:$0]  %s18_s17, 2048, %s20_s19, [#allocation7], %s387_s20, %s387_s20, %s388_s21  }
   0x5   :  { %382 = dma.done.wait [#allocation7], 2048  }
   0x6   :  { %383 = vsyncadd [#allocation7], 4294965248  ;;  %v64_v0 = vld [vmem:[#allocation6 + $0x78] sm:$0xff]  ;;  %v63_v1 = vld [vmem:[#allocation6 + $0x70] sm:$0xff]  ;;  %v389_v11 = vmov 0   ;;  %v90_v22 = vlaneseq  ;;  %vm38_vm7 = vcmask 7168  }
   0x7   :  { %65 = vmatpush.xpose.msra.mxu0 %v64_v0  ;;  %289 = vmatpush.xpose.msra.mxu1 %v64_v0  ;;  %v62_v2 = vld [vmem:[#allocation6 + $0x68] sm:$0xff]  ;;  %v61_v3 = vld [vmem:[#allocation6 + $0x60] sm:$0xff]  ;;  %v60_v4 = vld [vmem:[#allocation6 + $0x58] sm:$0xff]  ;;  %v390_v31 = vmov -1e+30   ;;  %v391_v40 = vmov 0.0  }
   0x8   :  { %v59_v5 = vld [vmem:[#allocation6 + $0x50] sm:$0xff]  ;;  %v58_v6 = vld [vmem:[#allocation6 + $0x48] sm:$0xff]  ;;  %v57_v7 = vld [vmem:[#allocation6 + $0x40] sm:$0xff]  ;;  %315 = vset.pattern.permute.xlu2 %v389_v11  ;;  %314 = vset.pattern.permute.xlu1 %v389_v11  ;;  %v91_v23 = vand.u32 127, %v90_v22  ;;  %v98_v24 = vshrl.u32 %v90_v22, 7  ;;  %39 = vst.msk [vmem:[#allocation2] sm:$0xff] %vm38_vm7, %v390_v31 }
   0x9   :  { %v56_v8 = vld [vmem:[#allocation6 + $0x38] sm:$0xff]  ;;  %v110_v9 = vld [vmem:[%s501_s2] sm:$0xff]  ;;  %v55_v10 = vld [vmem:[#allocation6 + $0x30] sm:$0xff]  ;;  %316 = vset.pattern.permute.xlu0 %v389_v11  ;;  %40 = vst.msk [vmem:[#allocation2 + $0x8] sm:$0xff] %vm38_vm7, %v390_v31  ;;  %s277_s6 = sshll.u32 %s503_s4, 4  ;;  %s278_s6 = int_to_ptr.hbm [resolvable:$true] %s277_s6 }
   0xa   :  { %113 = vperm.xlu2 %315, %v110_v9   ;;  %v54_v12 = vld [vmem:[#allocation6 + $0x28] sm:$0xff]  ;;  %v53_v14 = vld [vmem:[#allocation6 + $0x20] sm:$0xff]  ;;  %v52_v15 = vld [vmem:[#allocation6 + $0x18] sm:$0xff]  ;;  %vm95_vm0 = vcmp.lt.s32.totalorder %v91_v23, 16  ;;  %vm104_vm1 = vcmp.ne.s32.totalorder %v98_v24, %v91_v23  ;;  %v99_v28 = vadd.s32 8, %v98_v24  ;;  %41 = vst.msk [vmem:[#allocation3] sm:$0xff] %vm38_vm7, %v391_v40 }
   0xb   :  { %66 = vmatpush.xpose.msra.mxu0 %v63_v1  ;;  %290 = vmatpush.xpose.msra.mxu1 %v63_v1  ;;  %v111_v13 = vld [vmem:[%s501_s2 + $0x8] sm:$0xff]  ;;  %v51_v16 = vld [vmem:[#allocation6 + $0x10] sm:$0xff]  ;;  %v49_v18 = vld [vmem:[#allocation6] sm:$0xff]  ;;  %42 = vst.msk [vmem:[#allocation3 + $0x8] sm:$0xff] %vm38_vm7, %v391_v40 }
   0xc   :  { %v50_v17 = vld [vmem:[#allocation6 + $0x8] sm:$0xff]  ;;  %v47_v19 = vld [vmem:[%s499_s0] sm:$0xff]  ;;  %vm434_vm2 = vmand %vm95_vm0, %vm104_vm1  ;;  %vm105_vm4 = vcmp.ne.s32.totalorder %v99_v28, %v91_v23  ;;  %43 = vst.msk [vmem:[#allocation4] sm:$0xff] %vm38_vm7, %v391_v40 }
   0xd   :  { %v48_v20 = vld [vmem:[%s499_s0 + $0x8] sm:$0xff]  ;;  %v317_v27 = vld [vmem:[%s502_s3] ss:$0 sm:$0xff]  ;;  %vm442_vm5 = vmand %vm95_vm0, %vm105_vm4  ;;  %44 = vst.msk [vmem:[#allocation4 + $0x8] sm:$0xff] %vm38_vm7, %v391_v40  ;;  %s392_s0 = smov [#allocation9]  }
   0xe   :  { %45 = vst.msk [vmem:[#allocation5] sm:$0xff] %vm38_vm7, %v391_v40  ;;  %s275_s3 = sshll.u32 %s392_s0, 4  ;;  %s276_s3 = int_to_ptr.vmem [resolvable:$true] %s275_s3 }
   0xf   :  { %67 = vmatpush.xpose.msra.mxu0 %v62_v2  ;;  %291 = vmatpush.xpose.msra.mxu1 %v62_v2  ;;  %46 = vst.msk [vmem:[#allocation5 + $0x8] sm:$0xff] %vm38_vm7, %v391_v40  ;;  %v127_v43 = vld [vmem:[#allocation2] sm:$0xff] }
  0x10   :  { %v128_v47 = vld [vmem:[#allocation2 + $0x8] sm:$0xff] }
  0x12   :  { %116 = vperm.xlu2 %315, %v111_v13  }
  0x13   :  { %68 = vmatpush.xpose.msra.mxu0 %v61_v3  ;;  %292 = vmatpush.xpose.msra.mxu1 %v61_v3  ;;  %v170_v22 = vld [vmem:[#allocation4] sm:$0xff] }
  0x15   :  { %v182_v56 = vld [vmem:[#allocation5] sm:$0xff] }
  0x16   :  { %v183_v1 = vld [vmem:[#allocation5 + $0x8] sm:$0xff] }
  0x17   :  { %69 = vmatpush.xpose.msra.mxu0 %v60_v4  ;;  %293 = vmatpush.xpose.msra.mxu1 %v60_v4 }
  0x1b   :  { %70 = vmatpush.xpose.msra.mxu0 %v59_v5  ;;  %294 = vmatpush.xpose.msra.mxu1 %v59_v5 }
  0x1f   :  { %71 = vmatpush.xpose.msra.mxu0 %v58_v6  ;;  %295 = vmatpush.xpose.msra.mxu1 %v58_v6 }
  0x23   :  { %72 = vmatpush.xpose.msra.mxu0 %v57_v7  ;;  %296 = vmatpush.xpose.msra.mxu1 %v57_v7  ;;  %v157_v7 = vld [vmem:[#allocation3] sm:$0xff] }
  0x27   :  { %73 = vmatpush.xpose.msra.mxu0 %v56_v8  ;;  %297 = vmatpush.xpose.msra.mxu1 %v56_v8 }
  0x2b   :  { %74 = vmatpush.xpose.msra.mxu0 %v55_v10  ;;  %298 = vmatpush.xpose.msra.mxu1 %v55_v10 }
  0x2f   :  { %75 = vmatpush.xpose.msra.mxu0 %v54_v12  ;;  %299 = vmatpush.xpose.msra.mxu1 %v54_v12 }
  0x33   :  { %76 = vmatpush.xpose.msra.mxu0 %v53_v14  ;;  %300 = vmatpush.xpose.msra.mxu1 %v53_v14  ;;  %v158_v14 = vld [vmem:[#allocation3 + $0x8] sm:$0xff] }
  0x37   :  { %77 = vmatpush.xpose.msra.mxu0 %v52_v15  ;;  %301 = vmatpush.xpose.msra.mxu1 %v52_v15 }
  0x3b   :  { %78 = vmatpush.xpose.msra.mxu0 %v51_v16  ;;  %302 = vmatpush.xpose.msra.mxu1 %v51_v16 }
  0x3f   :  { %79 = vmatpush.xpose.msra.mxu0 %v50_v17  ;;  %303 = vmatpush.xpose.msra.mxu1 %v50_v17 }
  0x43   :  { %80 = vmatpush.xpose.msra.mxu0 %v49_v18  ;;  %304 = vmatpush.xpose.msra.mxu1 %v49_v18 }
  0x46   :  { %81 = vmatmul.f32.vlgmr.msra.gmra.mxu0 %v47_v19  ;;  %84 = vmatmul.f32.vlgmr.msra.gmra.mxu1 %v48_v20 }
  0x64   :  { %v114_v21 = vpop.permute.xlu2 %113 }
  0x65   :  { %vm119_vm8 = vcmp.eq.s32.totalorder %v114_v21, %v317_v27 }
  0x66   :  { %vm468_vm9 = vmand %vm434_vm2, %vm119_vm8 }
  0x67   :  { %v287_v42 = vsel %vm468_vm9, 1.0, %v391_v40 }
  0x6c   :  { %v117_v26 = vpop.permute.xlu2 %116 }
  0x6d   :  { %vm120_vm3 = vcmp.eq.s32.totalorder %v117_v26, %v317_v27 }
  0x6e   :  { %vm448_vm6 = vmand %vm442_vm5, %vm120_vm3 }
  0x6f   :  { %v288_v51 = vsel %vm448_vm6, 1.0, %v391_v40 }
  0xc3   :  { %v82_v32 = vpop.f32.mrf.mxu0  ;;  %v85_v33 = vpop.f32.mrf.mxu1 }
  0xc4   :  { %v88_v34 = vmul.f32 0.2, %v82_v32  ;;  %v89_v35 = vmul.f32 0.2, %v85_v33  ;;  %v171_v32 = vld [vmem:[#allocation4 + $0x8] sm:$0xff] }
  0xc6   :  { %v123_v36 = vsel %vm95_vm0, %v88_v34, -1e+30  ;;  %v125_v37 = vsel %vm434_vm2, %v88_v34, -1e+30  ;;  %v126_v38 = vsel %vm442_vm5, %v89_v35, -1e+30 }
  0xc7   :  { %129 = vmax.xlane.f32.xlu0 %v123_v36  ;;  %v124_v39 = vsel %vm95_vm0, %v89_v35, -1e+30  ;;  %v172_v63 = vsel %vm468_vm9, %v88_v34, 0.0  ;;  %v173_v0 = vsel %vm448_vm6, %v89_v35, 0.0 }
  0xcf   :  { %131 = vmax.xlane.f32.xlu0 %v124_v39 }
  0xd7   :  { %188 = vadd.xlane.f32.xlu0 %v287_v42 }
 0x13a   :  { %v130_v44 = vpop.xlane.xlu0 %129 }
 0x13b   :  { %v133_v45 = vmax.f32 %v127_v43, %v130_v44 }
 0x13d   :  { %v135_v46 = vsub.f32 %v127_v43, %v133_v45  ;;  %196 = vst.msk [vmem:[#allocation2] sm:$0xff] %vm38_vm7, %v133_v45  ;;  %143 = vperm.xlu1 %314, %v133_v45  }
 0x13f   :  { %v137_v4 = vmul.f32 1.442695, %v135_v46 }
 0x142   :  { %v132_v48 = vpop.xlane.xlu0 %131 }
 0x143   :  { %v134_v49 = vmax.f32 %v128_v47, %v132_v48 }
 0x145   :  { %v136_v50 = vsub.f32 %v128_v47, %v134_v49  ;;  %197 = vst.msk [vmem:[#allocation2 + $0x8] sm:$0xff] %vm38_vm7, %v134_v49  ;;  %148 = vperm.xlu1 %314, %v134_v49  }
 0x147   :  { %v139_v5 = vmul.f32 1.442695, %v136_v50 }
 0x14a   :  { %v189_v55 = vpop.xlane.xlu0 %188 }
 0x14b   :  { %v192_v57 = vadd.f32 %v189_v55, %v182_v56 }
 0x14c   :  { %v210_v56 = vld [vmem:[#allocation2 + $0x8] sm:$0xff] }
 0x14d   :  { %194 = vst.msk [vmem:[#allocation5] sm:$0xff] %vm38_vm7, %v192_v57 }
 0x154   :  { %v215_v9 = vld [vmem:[#allocation5] sm:$0xff] }
 0x155   :  { %vm222_vm10 = vweird.f32 %v215_v9  ;;  %v228_v33 = vand.u32 2147483648, %v215_v9  ;;  %v226_v35 = vand.u32 2147483647, %v215_v9 }
 0x157   :  { %v229_v41 = vor.u32 1.1754944e-38, %v228_v33  ;;  %vm227_vm15 = vcmp.eq.f32.partialorder %v226_v35, 8.507059e+37 }
 0x16f   :  { %190 = vadd.xlane.f32.xlu1 %v288_v51 }
 0x1af   :  { %v144_v52 = vpop.permute.xlu1 %143 }
 0x1b0   :  { %v151_v53 = vsub.f32 %v125_v37, %v144_v52 }
 0x1b2   :  { %v153_v54 = vmul.f32 1.442695, %v151_v53 }
 0x1b4   :  { %318 = vpow2.f32 %v153_v54  ;;  %v209_v54 = vld [vmem:[#allocation2] sm:$0xff] }
 0x1b7   :  { %v149_v58 = vpop.permute.xlu1 %148 }
 0x1b8   :  { %v152_v59 = vsub.f32 %v126_v38, %v149_v58 }
 0x1ba   :  { %v319_v60 = vpop.eup %318  ;;  %v155_v61 = vmul.f32 1.442695, %v152_v59 }
 0x1bb   :  { %161 = vadd.xlane.f32.xlu2 %v319_v60 }
 0x1bc   :  { %320 = vpow2.f32 %v155_v61 }
 0x1bd   :  { %322 = vpow2.f32 %v137_v4 }
 0x1be   :  { %324 = vpow2.f32 %v139_v5 }
 0x1bf   :  { %326 = vrcp.f32 %v215_v9 }
 0x1c2   :  { %v321_v62 = vpop.eup %320 }
 0x1c3   :  { %163 = vadd.xlane.f32.xlu0 %v321_v62  ;;  %v323_v6 = vpop.eup %322 }
 0x1c4   :  { %v159_v8 = vmul.f32 %v323_v6, %v157_v7  ;;  %v325_v13 = vpop.eup %324 }
 0x1c5   :  { %v160_v15 = vmul.f32 %v325_v13, %v158_v14  ;;  %v327_v16 = vpop.eup %326 }
 0x1c6   :  { %v218_v19 = vmul.f32 %v327_v16, %v215_v9  ;;  %vm223_vm11 = vweird.f32 %v327_v16 }
 0x1c7   :  { %vm487_vm12 = vmor %vm222_vm10, %vm223_vm11 }
 0x1c8   :  { %v219_v23 = vsub.f32 1.0, %v218_v19 }
 0x1ca   :  { %v220_v30 = vmul.f32 %v327_v16, %v219_v23 }
 0x1cb   :  { %174 = vadd.xlane.f32.xlu0 %v172_v63 }
 0x1cc   :  { %v221_v34 = vadd.f32 %v327_v16, %v220_v30 }
 0x1ce   :  { %v225_v43 = vsel %vm487_vm12, %v327_v16, %v221_v34 }
 0x1cf   :  { %v230_v49 = vsel %vm227_vm15, %v229_v41, %v225_v43 }
 0x1d3   :  { %176 = vadd.xlane.f32.xlu0 %v173_v0 }
 0x1e2   :  { %v191_v2 = vpop.xlane.xlu1 %190 }
 0x1e3   :  { %v193_v3 = vadd.f32 %v191_v2, %v183_v1 }
 0x1e5   :  { %195 = vst.msk [vmem:[#allocation5 + $0x8] sm:$0xff] %vm38_vm7, %v193_v3 }
 0x1ec   :  { %v216_v12 = vld [vmem:[#allocation5 + $0x8] sm:$0xff] }
 0x1ed   :  { %328 = vrcp.f32 %v216_v12  ;;  %vm237_vm13 = vweird.f32 %v216_v12  ;;  %v243_v42 = vand.u32 2147483648, %v216_v12  ;;  %v241_v45 = vand.u32 2147483647, %v216_v12 }
 0x1ef   :  { %v244_v50 = vor.u32 1.1754944e-38, %v243_v42  ;;  %vm242_vm1 = vcmp.eq.f32.partialorder %v241_v45, 8.507059e+37 }
 0x1f3   :  { %v329_v20 = vpop.eup %328 }
 0x1f4   :  { %v233_v24 = vmul.f32 %v329_v20, %v216_v12  ;;  %vm238_vm14 = vweird.f32 %v329_v20 }
 0x1f5   :  { %vm239_vm0 = vmor %vm237_vm13, %vm238_vm14 }
 0x1f6   :  { %v234_v31 = vsub.f32 1.0, %v233_v24 }
 0x1f8   :  { %v235_v36 = vmul.f32 %v329_v20, %v234_v31 }
 0x1fa   :  { %v236_v44 = vadd.f32 %v329_v20, %v235_v36 }
 0x1fc   :  { %v240_v53 = vsel %vm239_vm0, %v329_v20, %v236_v44 }
 0x1fd   :  { %v245_v58 = vsel %vm242_vm1, %v244_v50, %v240_v53 }
 0x22e   :  { %v162_v10 = vpop.xlane.xlu2 %161 }
 0x22f   :  { %v165_v11 = vadd.f32 %v162_v10, %v159_v8 }
 0x231   :  { %168 = vst.msk [vmem:[#allocation3] sm:$0xff] %vm38_vm7, %v165_v11 }
 0x236   :  { %v164_v17 = vpop.xlane.xlu0 %163 }
 0x237   :  { %v166_v18 = vadd.f32 %v164_v17, %v160_v15 }
 0x238   :  { %v201_v21 = vld [vmem:[#allocation3] sm:$0xff] }
 0x239   :  { %169 = vst.msk [vmem:[#allocation3 + $0x8] sm:$0xff] %vm38_vm7, %v166_v18  ;;  %v203_v26 = vmax.f32 %v201_v21, 1e-10 }
 0x23b   :  { %330 = vlog2.f32 %v203_v26 }
 0x23e   :  { %v175_v25 = vpop.xlane.xlu0 %174 }
 0x23f   :  { %v178_v27 = vadd.f32 %v175_v25, %v170_v22 }
 0x240   :  { %v202_v28 = vld [vmem:[#allocation3 + $0x8] sm:$0xff] }
 0x241   :  { %180 = vst.msk [vmem:[#allocation4] sm:$0xff] %vm38_vm7, %v178_v27  ;;  %v204_v29 = vmax.f32 %v202_v28, 1e-10  ;;  %v331_v40 = vpop.eup %330 }
 0x242   :  { %v206_v48 = vmul.f32 0.6931472, %v331_v40 }
 0x243   :  { %332 = vlog2.f32 %v204_v29 }
 0x244   :  { %v211_v55 = vadd.f32 %v209_v54, %v206_v48 }
 0x246   :  { %v177_v37 = vpop.xlane.xlu0 %176 }
 0x247   :  { %v179_v39 = vadd.f32 %v177_v37, %v171_v32 }
 0x248   :  { %v213_v47 = vld [vmem:[#allocation4] sm:$0xff] }
 0x249   :  { %181 = vst.msk [vmem:[#allocation4 + $0x8] sm:$0xff] %vm38_vm7, %v179_v39  ;;  %v333_v46 = vpop.eup %332  ;;  %v231_v52 = vmul.f32 %v230_v49, %v213_v47 }
 0x24a   :  { %v208_v51 = vmul.f32 0.6931472, %v333_v46 }
 0x24b   :  { %v247_v61 = vsub.f32 %v211_v55, %v231_v52 }
 0x24c   :  { %v212_v59 = vadd.f32 %v210_v56, %v208_v51 }
 0x24d   :  { %v256_v63 = vsel %vm38_vm7, %v247_v61, 0.0 }
 0x250   :  { %v214_v57 = vld [vmem:[#allocation4 + $0x8] sm:$0xff] }
 0x251   :  { %v246_v60 = vmul.f32 %v245_v58, %v214_v57 }
 0x253   :  { %v248_v62 = vsub.f32 %v212_v59, %v246_v60 }
 0x255   :  { %v257_v0 = vsel %vm38_vm7, %v248_v62, 0.0 }
 0x256   :  { %v258_v1 = vadd.f32 %v257_v0, %v256_v63 }
 0x258   :  { %259 = vadd.xlane.f32.xlu0 %v258_v1 }
 0x2cb   :  { %v260_v2 = vpop.xlane.xlu0 %259 }
 0x2cc   :  { %v261_v3 = vrot.slane %v260_v2, 4 }
 0x2ce   :  { %v262_v4 = vadd.f32 %v261_v3, %v260_v2 }
 0x2d0   :  { %v263_v5 = vrot.slane %v262_v4, 2 }
 0x2d2   :  { %v264_v6 = vadd.f32 %v263_v5, %v262_v4 }
 0x2d4   :  { %v265_v7 = vrot.slane %v264_v6, 1 }
 0x2d6   :  { %v266_v8 = vadd.f32 %v265_v7, %v264_v6 }
 0x2d8   :  { %305 = vpush %v266_v8 }
 0x309   :  { %s306_s7 = spop %305 }
 0x30a   :  { %v268_v9 = vstv %s306_s7 }
 0x30b   :  { %269 = vst [vmem:[#allocation9] sm:$0xff] %v268_v9 }
 0x30c   :  { %280 = dma.vmem_to_hbm [thread:$0]  %s276_s3, 128, %s278_s6, [#allocation8]  }
 0x30d   :  { %384 = dma.done.wait [#allocation8], 128  }
 0x30e   :  { %385 = vsyncadd [#allocation8], 4294967168 }
 0x30f   :  { %285 = vsyncpa [#allocation7], 1 }
 0x310   :  { %286 = vsyncpa [#allocation8], 1 }

</bundles_post_ra>
